<compile_context>
chip_gen: v6e
topology: v6e:2x2x1
jax: 0.10.0
libtpu: 0.0.40
codegen_flags: <defaults>
</compile_context>

<pallas_src>
import functools

import jax
import jax.numpy as jnp
from jax.experimental import pallas as pl
from jax.experimental.pallas import tpu as pltpu

# Fixed (non-learnable) depthwise Laplacian edge kernel, 3x3 (reference only).
_LAP = ((-1.0, -1.0, -1.0),
        (-1.0,  8.0, -1.0),
        (-1.0, -1.0, -1.0))


def _laplacian_flat(x, masks, W):
    """Depthwise 3x3 Laplacian (zero padding) on a lane-dense (R, H*W) layout.

    lap(x) = 9*x - box3x3(x); box3x3 is computed separably and the +-1 / +-W
    shifts are circular pltpu.roll's (XLU slot).  Wrap-around elements are
    killed by precomputed (1, HW) boundary masks -> no in-kernel iota / div /
    mod / compares on the VALU.
    """
    HW = x.shape[-1]
    left = masks[0:1, :] * pltpu.roll(x, shift=1, axis=1)
    right = masks[1:2, :] * pltpu.roll(x, shift=HW - 1, axis=1)
    row3 = x + left + right                                   # 1x3 box
    up = masks[2:3, :] * pltpu.roll(row3, shift=W, axis=1)
    down = masks[3:4, :] * pltpu.roll(row3, shift=HW - W, axis=1)
    return 9.0 * x - (row3 + up + down)                       # 9*x - 3x3 box


def _edge_enhance_vpu_kernel(x_ref, masks_ref, w1_ref, b1_ref, out_ref, *,
                             C, B, W):
    # x_ref    : (B*C, H*W) VMEM  B images stacked along sublanes, lane-dense
    # masks_ref: (4, H*W)   VMEM  [left, right, up, down] validity masks (f32)
    # w1_ref   : (C, C)     SMEM  1x1 conv weight (out_ch, in_ch)
    # b1_ref   : (C,)       SMEM  1x1 conv bias
    # out_ref  : (B*C, H*W) VMEM
    x = x_ref[...].astype(jnp.float32)
    edge = _laplacian_flat(x, masks_ref[...], W)
    # Channel mix on the VPU: B*C*C scalar broadcast-MACs (C tiny, skip MXU).
    # TODO(synk): for very large HW tiles bound live ranges with an unrolled
    # lax.fori_loop over (img, o) writing into a VMEM scratch slab instead of
    # holding all B*C rows before the store.
    rows = []
    for img in range(B):
        base = img * C
        for o in range(C):
            acc = w1_ref[o, 0] * edge[base:base + 1, :]
            for c in range(1, C):
                acc = acc + w1_ref[o, c] * edge[base + c:base + c + 1, :]
            gate = jax.nn.sigmoid(acc + b1_ref[o])
            rows.append(x[base + o:base + o + 1, :] * (1.0 + gate))
    # Single full-slab store (dense vst's) instead of B*C sublane-partial ones.
    out_ref[...] = jnp.concatenate(rows, axis=0).astype(out_ref.dtype)


def _edge_enhance_mxu_kernel(x_ref, masks_ref, w1_ref, b1_ref, out_ref, *, W):
    # x_ref : (C, H*W) VMEM ; w1_ref : (C, C) VMEM ; b1_ref : (C, 1) VMEM
    x = x_ref[...].astype(jnp.float32)
    edge = _laplacian_flat(x, masks_ref[...], W)
    y = jnp.dot(w1_ref[...].astype(jnp.bfloat16), edge.astype(jnp.bfloat16),
                preferred_element_type=jnp.float32)
    gate = jax.nn.sigmoid(y + b1_ref[...].astype(jnp.float32))
    out_ref[...] = (x * (1.0 + gate)).astype(out_ref.dtype)


def _choose_images_per_block(N, C, HW, bytes_per_elem, max_block_bytes=2 << 20):
    """Smallest divisor B of N filling vreg sublanes ((B*C) % 8 == 0), within
    a ~2 MiB block budget; falls back to the largest feasible divisor."""
    best = 1
    for b in range(1, N + 1):
        if N % b:
            continue
        if b * C * HW * bytes_per_elem > max_block_bytes:
            break
        best = b
        if (b * C) % 8 == 0:
            break
    return best


@functools.partial(jax.jit, static_argnames=("io_dtype",))
def dct_forward(x, w1, b1, *, io_dtype=jnp.bfloat16):
    """DCT.forward == EdgeEnhancement(in_channels)(x).

    x: (N, C, H, W); w1: (C, C) 1x1-conv weight; b1: (C,) bias.
    Returns (N, C, H, W) in io_dtype (bf16 by default: halves HBM traffic;
    kernel accumulates in f32).
    """
    N, C, H, W = x.shape
    HW = H * W
    io_dtype = jnp.dtype(io_dtype)

    # Precomputed boundary-validity masks (left/right/up/down) -> keeps all
    # iota / div / mod / compare work out of the kernel's VALU slot.
    col = jnp.arange(HW, dtype=jnp.int32)
    w_idx = col % W
    h_idx = col // W
    masks = jnp.stack(
        [w_idx != 0, w_idx != W - 1, h_idx != 0, h_idx != H - 1],
        axis=0).astype(jnp.float32)                              # (4, HW)

    x_io = x.astype(io_dtype)

    if C <= 8:
        # Tiny channel count: stack B images along the sublane axis so each
        # block fills vregs and amortizes per-grid-step overhead; channel mix
        # stays on the VPU with params on the scalar path.
        B = _choose_images_per_block(N, C, HW, io_dtype.itemsize)
        G, BC = N // B, B * C
        kernel = functools.partial(_edge_enhance_vpu_kernel, C=C, B=B, W=W)
        param_specs = [
            pl.BlockSpec(memory_space=pltpu.MemorySpace.SMEM),   # w1 (C, C)
            pl.BlockSpec(memory_space=pltpu.MemorySpace.SMEM),   # b1 (C,)
        ]
        params = (w1.astype(jnp.float32), b1.astype(jnp.float32))
    else:
        B, G, BC = 1, N, C
        kernel = functools.partial(_edge_enhance_mxu_kernel, W=W)
        param_specs = [
            pl.BlockSpec((C, C), lambda n: (0, 0)),              # resident
            pl.BlockSpec((C, 1), lambda n: (0, 0)),              # resident
        ]
        params = (w1.astype(jnp.float32),
                  b1.astype(jnp.float32).reshape(C, 1))

    x_flat = x_io.reshape(G, BC, HW)        # contiguous: metadata-only reshape

    img_spec = pl.BlockSpec((pl.Squeezed(), BC, HW), lambda n: (n, 0, 0))
    mask_spec = pl.BlockSpec((4, HW), lambda n: (0, 0))          # resident

    # Explicit scoped-VMEM budget: double-buffered io blocks + resident masks
    # + f32 temporaries, with headroom; floored at 16 MiB (v5e scoped default),
    # capped well under v7x's 64 MiB physical VMEM.
    io_block = BC * HW * io_dtype.itemsize
    est = 4 * io_block + 4 * HW * 4 + 10 * BC * HW * 4 + 64 * 1024
    vmem_limit = int(min(48 * 1024 * 1024, max(16 * 1024 * 1024, 2 * est)))

    out_flat = pl.pallas_call(
        kernel,
        out_shape=jax.ShapeDtypeStruct((G, BC, HW), io_dtype),
        grid_spec=pltpu.PrefetchScalarGridSpec(
            num_scalar_prefetch=0,
            grid=(G,),
            in_specs=[img_spec, mask_spec] + param_specs,
            out_specs=pl.BlockSpec((pl.Squeezed(), BC, HW), lambda n: (n, 0, 0)),
        ),
        compiler_params=pltpu.CompilerParams(
            dimension_semantics=("parallel",),
            vmem_limit_bytes=vmem_limit),
    )(x_flat, masks, *params)
    return out_flat.reshape(N, C, H, W)


def _reference_forward(x, w1, b1):
    """Pure-JAX f32 reference for verification."""
    N, C, H, W = x.shape
    xpad = jnp.pad(x, ((0, 0), (0, 0), (1, 1), (1, 1)))
    edge = jnp.zeros_like(x)
    for di in range(3):
        for dj in range(3):
            edge = edge + _LAP[di][dj] * xpad[:, :, di:di + H, dj:dj + W]
    y = jnp.einsum("oc,nchw->nohw", w1, edge) + b1[None, :, None, None]
    return x + x * jax.nn.sigmoid(y)


if __name__ == "__main__":
    key = jax.random.PRNGKey(0)
    kx, kw, kb, kx2, kw2, kb2 = jax.random.split(key, 6)

    # --- VPU path (tiny C): strict f32 check + default bf16-I/O check. ---
    N, C, H, W = 2, 4, 16, 16
    x = jax.random.normal(kx, (N, C, H, W), dtype=jnp.float32)
    w1 = jax.random.normal(kw, (C, C), dtype=jnp.float32) * (1.0 / jnp.sqrt(C))
    b1 = jax.random.normal(kb, (C,), dtype=jnp.float32) * 0.01
    ref = _reference_forward(x, w1, b1)

    out_f32 = jax.block_until_ready(dct_forward(x, w1, b1, io_dtype=jnp.float32))
    assert out_f32.shape == (N, C, H, W)
    assert jnp.allclose(out_f32, ref, atol=1e-4, rtol=1e-4), "f32 mismatch"

    out_bf16 = jax.block_until_ready(dct_forward(x, w1, b1))   # default bf16 I/O
    assert out_bf16.dtype == jnp.bfloat16
    assert jnp.allclose(out_bf16.astype(jnp.float32), ref,
                        atol=1e-1, rtol=5e-2), "bf16 I/O mismatch"

    # --- MXU path (larger C); bf16 MXU operands -> looser tolerance. ---
    N2, C2 = 1, 16
    x2 = jax.random.normal(kx2, (N2, C2, H, W), dtype=jnp.float32)
    w2 = jax.random.normal(kw2, (C2, C2), dtype=jnp.float32) * (1.0 / jnp.sqrt(C2))
    b2 = jax.random.normal(kb2, (C2,), dtype=jnp.float32) * 0.01
    ref2 = _reference_forward(x2, w2, b2)
    out2 = jax.block_until_ready(dct_forward(x2, w2, b2, io_dtype=jnp.float32))
    assert jnp.allclose(out2, ref2, atol=1e-1, rtol=1e-1), "MXU-path mismatch"

    print("KERNEL_OK")
</pallas_src>

<mosaic_0001>
module attributes {stable_mosaic.version = 11 : i64} {
  func.func @_edge_enhance_vpu_kernel(%arg0: i32, %arg1: memref<1x8x256xf32, #tpu.memory_space<vmem>>, %arg2: memref<4x256xf32, #tpu.memory_space<vmem>>, %arg3: memref<4x4xf32, #tpu.memory_space<smem>>, %arg4: memref<4xf32, #tpu.memory_space<smem>>, %arg5: memref<1x8x256xf32, #tpu.memory_space<vmem>>) attributes {dimension_semantics = [#tpu.dimension_semantics<parallel>], iteration_bounds = array<i64: 1>, scalar_prefetch = 0 : i64, scratch_operands = 0 : i64, tpu.core_type = #tpu.core_type<tc>, window_params = [{transform_indices = @transform_0, window_bounds = array<i64: 1, 8, 256>}, {pipeline_mode = #tpu.pipeline_mode<synchronous>, transform_indices = @transform_1, window_bounds = array<i64: 4, 256>}, {transform_indices = @transform_2, window_bounds = array<i64: 4, 4>}, {transform_indices = @transform_3, window_bounds = array<i64: 4>}, {transform_indices = @transform_4, window_bounds = array<i64: 1, 8, 256>}]} {
    %c0 = arith.constant 0 : index
    %c0_0 = arith.constant 0 : index
    %c0_1 = arith.constant 0 : index
    %0 = vector.load %arg1[%c0, %c0_0, %c0_1] : memref<1x8x256xf32, #tpu.memory_space<vmem>>, vector<1x8x256xf32>
    %1 = vector.shape_cast %0 : vector<1x8x256xf32> to vector<8x256xf32>
    %c0_2 = arith.constant 0 : index
    %c0_3 = arith.constant 0 : index
    %2 = vector.load %arg2[%c0_2, %c0_3] : memref<4x256xf32, #tpu.memory_space<vmem>>, vector<4x256xf32>
    %3 = vector.extract_strided_slice %2 {offsets = [0, 0], sizes = [1, 256], strides = [1, 1]} : vector<4x256xf32> to vector<1x256xf32>
    %c1_i32 = arith.constant 1 : i32
    %4 = tpu.dynamic_rotate %1 by %c1_i32 dim 1 : vector<8x256xf32>, i32 -> vector<8x256xf32>
    %5 = vector.broadcast %3 : vector<1x256xf32> to vector<8x256xf32>
    %6 = arith.mulf %5, %4 : vector<8x256xf32>
    %7 = vector.extract_strided_slice %2 {offsets = [1, 0], sizes = [1, 256], strides = [1, 1]} : vector<4x256xf32> to vector<1x256xf32>
    %c255_i32 = arith.constant 255 : i32
    %8 = tpu.dynamic_rotate %1 by %c255_i32 dim 1 : vector<8x256xf32>, i32 -> vector<8x256xf32>
    %9 = vector.broadcast %7 : vector<1x256xf32> to vector<8x256xf32>
    %10 = arith.mulf %9, %8 : vector<8x256xf32>
    %11 = arith.addf %1, %6 : vector<8x256xf32>
    %12 = arith.addf %11, %10 : vector<8x256xf32>
    %13 = vector.extract_strided_slice %2 {offsets = [2, 0], sizes = [1, 256], strides = [1, 1]} : vector<4x256xf32> to vector<1x256xf32>
    %c16_i32 = arith.constant 16 : i32
    %14 = tpu.dynamic_rotate %12 by %c16_i32 dim 1 : vector<8x256xf32>, i32 -> vector<8x256xf32>
    %15 = vector.broadcast %13 : vector<1x256xf32> to vector<8x256xf32>
    %16 = arith.mulf %15, %14 : vector<8x256xf32>
    %17 = vector.extract_strided_slice %2 {offsets = [3, 0], sizes = [1, 256], strides = [1, 1]} : vector<4x256xf32> to vector<1x256xf32>
    %c240_i32 = arith.constant 240 : i32
    %18 = tpu.dynamic_rotate %12 by %c240_i32 dim 1 : vector<8x256xf32>, i32 -> vector<8x256xf32>
    %19 = vector.broadcast %17 : vector<1x256xf32> to vector<8x256xf32>
    %20 = arith.mulf %19, %18 : vector<8x256xf32>
    %cst = arith.constant 9.000000e+00 : f32
    %21 = vector.broadcast %cst : f32 to vector<8x256xf32>
    %22 = arith.mulf %21, %1 : vector<8x256xf32>
    %23 = arith.addf %12, %16 : vector<8x256xf32>
    %24 = arith.addf %23, %20 : vector<8x256xf32>
    %25 = arith.subf %22, %24 : vector<8x256xf32>
    %c0_4 = arith.constant 0 : index
    %c0_5 = arith.constant 0 : index
    %26 = memref.load %arg3[%c0_4, %c0_5] : memref<4x4xf32, #tpu.memory_space<smem>>
    %27 = vector.extract_strided_slice %25 {offsets = [0, 0], sizes = [1, 256], strides = [1, 1]} : vector<8x256xf32> to vector<1x256xf32>
    %28 = vector.broadcast %26 : f32 to vector<1x256xf32>
    %29 = arith.mulf %28, %27 : vector<1x256xf32>
    %c0_6 = arith.constant 0 : index
    %c1 = arith.constant 1 : index
    %30 = memref.load %arg3[%c0_6, %c1] : memref<4x4xf32, #tpu.memory_space<smem>>
    %31 = vector.extract_strided_slice %25 {offsets = [1, 0], sizes = [1, 256], strides = [1, 1]} : vector<8x256xf32> to vector<1x256xf32>
    %32 = vector.broadcast %30 : f32 to vector<1x256xf32>
    %33 = arith.mulf %32, %31 : vector<1x256xf32>
    %34 = arith.addf %29, %33 : vector<1x256xf32>
    %c0_7 = arith.constant 0 : index
    %c2 = arith.constant 2 : index
    %35 = memref.load %arg3[%c0_7, %c2] : memref<4x4xf32, #tpu.memory_space<smem>>
    %36 = vector.extract_strided_slice %25 {offsets = [2, 0], sizes = [1, 256], strides = [1, 1]} : vector<8x256xf32> to vector<1x256xf32>
    %37 = vector.broadcast %35 : f32 to vector<1x256xf32>
    %38 = arith.mulf %37, %36 : vector<1x256xf32>
    %39 = arith.addf %34, %38 : vector<1x256xf32>
    %c0_8 = arith.constant 0 : index
    %c3 = arith.constant 3 : index
    %40 = memref.load %arg3[%c0_8, %c3] : memref<4x4xf32, #tpu.memory_space<smem>>
    %41 = vector.extract_strided_slice %25 {offsets = [3, 0], sizes = [1, 256], strides = [1, 1]} : vector<8x256xf32> to vector<1x256xf32>
    %42 = vector.broadcast %40 : f32 to vector<1x256xf32>
    %43 = arith.mulf %42, %41 : vector<1x256xf32>
    %44 = arith.addf %39, %43 : vector<1x256xf32>
    %c0_9 = arith.constant 0 : index
    %45 = memref.load %arg4[%c0_9] : memref<4xf32, #tpu.memory_space<smem>>
    %46 = vector.broadcast %45 : f32 to vector<1x256xf32>
    %47 = arith.addf %44, %46 : vector<1x256xf32>
    %48 = arith.negf %47 : vector<1x256xf32>
    %49 = math.exp %48 : vector<1x256xf32>
    %cst_10 = arith.constant 1.000000e+00 : f32
    %50 = vector.broadcast %cst_10 : f32 to vector<1x256xf32>
    %51 = arith.addf %50, %49 : vector<1x256xf32>
    %52 = arith.divf %50, %51 : vector<1x256xf32>
    %53 = vector.extract_strided_slice %1 {offsets = [0, 0], sizes = [1, 256], strides = [1, 1]} : vector<8x256xf32> to vector<1x256xf32>
    %cst_11 = arith.constant 1.000000e+00 : f32
    %54 = vector.broadcast %cst_11 : f32 to vector<1x256xf32>
    %55 = arith.addf %54, %52 : vector<1x256xf32>
    %56 = arith.mulf %53, %55 : vector<1x256xf32>
    %c1_12 = arith.constant 1 : index
    %c0_13 = arith.constant 0 : index
    %57 = memref.load %arg3[%c1_12, %c0_13] : memref<4x4xf32, #tpu.memory_space<smem>>
    %58 = vector.extract_strided_slice %25 {offsets = [0, 0], sizes = [1, 256], strides = [1, 1]} : vector<8x256xf32> to vector<1x256xf32>
    %59 = vector.broadcast %57 : f32 to vector<1x256xf32>
    %60 = arith.mulf %59, %58 : vector<1x256xf32>
    %c1_14 = arith.constant 1 : index
    %c1_15 = arith.constant 1 : index
    %61 = memref.load %arg3[%c1_14, %c1_15] : memref<4x4xf32, #tpu.memory_space<smem>>
    %62 = vector.extract_strided_slice %25 {offsets = [1, 0], sizes = [1, 256], strides = [1, 1]} : vector<8x256xf32> to vector<1x256xf32>
    %63 = vector.broadcast %61 : f32 to vector<1x256xf32>
    %64 = arith.mulf %63, %62 : vector<1x256xf32>
    %65 = arith.addf %60, %64 : vector<1x256xf32>
    %c1_16 = arith.constant 1 : index
    %c2_17 = arith.constant 2 : index
    %66 = memref.load %arg3[%c1_16, %c2_17] : memref<4x4xf32, #tpu.memory_space<smem>>
    %67 = vector.extract_strided_slice %25 {offsets = [2, 0], sizes = [1, 256], strides = [1, 1]} : vector<8x256xf32> to vector<1x256xf32>
    %68 = vector.broadcast %66 : f32 to vector<1x256xf32>
    %69 = arith.mulf %68, %67 : vector<1x256xf32>
    %70 = arith.addf %65, %69 : vector<1x256xf32>
    %c1_18 = arith.constant 1 : index
    %c3_19 = arith.constant 3 : index
    %71 = memref.load %arg3[%c1_18, %c3_19] : memref<4x4xf32, #tpu.memory_space<smem>>
    %72 = vector.extract_strided_slice %25 {offsets = [3, 0], sizes = [1, 256], strides = [1, 1]} : vector<8x256xf32> to vector<1x256xf32>
    %73 = vector.broadcast %71 : f32 to vector<1x256xf32>
    %74 = arith.mulf %73, %72 : vector<1x256xf32>
    %75 = arith.addf %70, %74 : vector<1x256xf32>
    %c1_20 = arith.constant 1 : index
    %76 = memref.load %arg4[%c1_20] : memref<4xf32, #tpu.memory_space<smem>>
    %77 = vector.broadcast %76 : f32 to vector<1x256xf32>
    %78 = arith.addf %75, %77 : vector<1x256xf32>
    %79 = arith.negf %78 : vector<1x256xf32>
    %80 = math.exp %79 : vector<1x256xf32>
    %cst_21 = arith.constant 1.000000e+00 : f32
    %81 = vector.broadcast %cst_21 : f32 to vector<1x256xf32>
    %82 = arith.addf %81, %80 : vector<1x256xf32>
    %83 = arith.divf %81, %82 : vector<1x256xf32>
    %84 = vector.extract_strided_slice %1 {offsets = [1, 0], sizes = [1, 256], strides = [1, 1]} : vector<8x256xf32> to vector<1x256xf32>
    %cst_22 = arith.constant 1.000000e+00 : f32
    %85 = vector.broadcast %cst_22 : f32 to vector<1x256xf32>
    %86 = arith.addf %85, %83 : vector<1x256xf32>
    %87 = arith.mulf %84, %86 : vector<1x256xf32>
    %c2_23 = arith.constant 2 : index
    %c0_24 = arith.constant 0 : index
    %88 = memref.load %arg3[%c2_23, %c0_24] : memref<4x4xf32, #tpu.memory_space<smem>>
    %89 = vector.extract_strided_slice %25 {offsets = [0, 0], sizes = [1, 256], strides = [1, 1]} : vector<8x256xf32> to vector<1x256xf32>
    %90 = vector.broadcast %88 : f32 to vector<1x256xf32>
    %91 = arith.mulf %90, %89 : vector<1x256xf32>
    %c2_25 = arith.constant 2 : index
    %c1_26 = arith.constant 1 : index
    %92 = memref.load %arg3[%c2_25, %c1_26] : memref<4x4xf32, #tpu.memory_space<smem>>
    %93 = vector.extract_strided_slice %25 {offsets = [1, 0], sizes = [1, 256], strides = [1, 1]} : vector<8x256xf32> to vector<1x256xf32>
    %94 = vector.broadcast %92 : f32 to vector<1x256xf32>
    %95 = arith.mulf %94, %93 : vector<1x256xf32>
    %96 = arith.addf %91, %95 : vector<1x256xf32>
    %c2_27 = arith.constant 2 : index
    %c2_28 = arith.constant 2 : index
    %97 = memref.load %arg3[%c2_27, %c2_28] : memref<4x4xf32, #tpu.memory_space<smem>>
    %98 = vector.extract_strided_slice %25 {offsets = [2, 0], sizes = [1, 256], strides = [1, 1]} : vector<8x256xf32> to vector<1x256xf32>
    %99 = vector.broadcast %97 : f32 to vector<1x256xf32>
    %100 = arith.mulf %99, %98 : vector<1x256xf32>
    %101 = arith.addf %96, %100 : vector<1x256xf32>
    %c2_29 = arith.constant 2 : index
    %c3_30 = arith.constant 3 : index
    %102 = memref.load %arg3[%c2_29, %c3_30] : memref<4x4xf32, #tpu.memory_space<smem>>
    %103 = vector.extract_strided_slice %25 {offsets = [3, 0], sizes = [1, 256], strides = [1, 1]} : vector<8x256xf32> to vector<1x256xf32>
    %104 = vector.broadcast %102 : f32 to vector<1x256xf32>
    %105 = arith.mulf %104, %103 : vector<1x256xf32>
    %106 = arith.addf %101, %105 : vector<1x256xf32>
    %c2_31 = arith.constant 2 : index
    %107 = memref.load %arg4[%c2_31] : memref<4xf32, #tpu.memory_space<smem>>
    %108 = vector.broadcast %107 : f32 to vector<1x256xf32>
    %109 = arith.addf %106, %108 : vector<1x256xf32>
    %110 = arith.negf %109 : vector<1x256xf32>
    %111 = math.exp %110 : vector<1x256xf32>
    %cst_32 = arith.constant 1.000000e+00 : f32
    %112 = vector.broadcast %cst_32 : f32 to vector<1x256xf32>
    %113 = arith.addf %112, %111 : vector<1x256xf32>
    %114 = arith.divf %112, %113 : vector<1x256xf32>
    %115 = vector.extract_strided_slice %1 {offsets = [2, 0], sizes = [1, 256], strides = [1, 1]} : vector<8x256xf32> to vector<1x256xf32>
    %cst_33 = arith.constant 1.000000e+00 : f32
    %116 = vector.broadcast %cst_33 : f32 to vector<1x256xf32>
    %117 = arith.addf %116, %114 : vector<1x256xf32>
    %118 = arith.mulf %115, %117 : vector<1x256xf32>
    %c3_34 = arith.constant 3 : index
    %c0_35 = arith.constant 0 : index
    %119 = memref.load %arg3[%c3_34, %c0_35] : memref<4x4xf32, #tpu.memory_space<smem>>
    %120 = vector.extract_strided_slice %25 {offsets = [0, 0], sizes = [1, 256], strides = [1, 1]} : vector<8x256xf32> to vector<1x256xf32>
    %121 = vector.broadcast %119 : f32 to vector<1x256xf32>
    %122 = arith.mulf %121, %120 : vector<1x256xf32>
    %c3_36 = arith.constant 3 : index
    %c1_37 = arith.constant 1 : index
    %123 = memref.load %arg3[%c3_36, %c1_37] : memref<4x4xf32, #tpu.memory_space<smem>>
    %124 = vector.extract_strided_slice %25 {offsets = [1, 0], sizes = [1, 256], strides = [1, 1]} : vector<8x256xf32> to vector<1x256xf32>
    %125 = vector.broadcast %123 : f32 to vector<1x256xf32>
    %126 = arith.mulf %125, %124 : vector<1x256xf32>
    %127 = arith.addf %122, %126 : vector<1x256xf32>
    %c3_38 = arith.constant 3 : index
    %c2_39 = arith.constant 2 : index
    %128 = memref.load %arg3[%c3_38, %c2_39] : memref<4x4xf32, #tpu.memory_space<smem>>
    %129 = vector.extract_strided_slice %25 {offsets = [2, 0], sizes = [1, 256], strides = [1, 1]} : vector<8x256xf32> to vector<1x256xf32>
    %130 = vector.broadcast %128 : f32 to vector<1x256xf32>
    %131 = arith.mulf %130, %129 : vector<1x256xf32>
    %132 = arith.addf %127, %131 : vector<1x256xf32>
    %c3_40 = arith.constant 3 : index
    %c3_41 = arith.constant 3 : index
    %133 = memref.load %arg3[%c3_40, %c3_41] : memref<4x4xf32, #tpu.memory_space<smem>>
    %134 = vector.extract_strided_slice %25 {offsets = [3, 0], sizes = [1, 256], strides = [1, 1]} : vector<8x256xf32> to vector<1x256xf32>
    %135 = vector.broadcast %133 : f32 to vector<1x256xf32>
    %136 = arith.mulf %135, %134 : vector<1x256xf32>
    %137 = arith.addf %132, %136 : vector<1x256xf32>
    %c3_42 = arith.constant 3 : index
    %138 = memref.load %arg4[%c3_42] : memref<4xf32, #tpu.memory_space<smem>>
    %139 = vector.broadcast %138 : f32 to vector<1x256xf32>
    %140 = arith.addf %137, %139 : vector<1x256xf32>
    %141 = arith.negf %140 : vector<1x256xf32>
    %142 = math.exp %141 : vector<1x256xf32>
    %cst_43 = arith.constant 1.000000e+00 : f32
    %143 = vector.broadcast %cst_43 : f32 to vector<1x256xf32>
    %144 = arith.addf %143, %142 : vector<1x256xf32>
    %145 = arith.divf %143, %144 : vector<1x256xf32>
    %146 = vector.extract_strided_slice %1 {offsets = [3, 0], sizes = [1, 256], strides = [1, 1]} : vector<8x256xf32> to vector<1x256xf32>
    %cst_44 = arith.constant 1.000000e+00 : f32
    %147 = vector.broadcast %cst_44 : f32 to vector<1x256xf32>
    %148 = arith.addf %147, %145 : vector<1x256xf32>
    %149 = arith.mulf %146, %148 : vector<1x256xf32>
    %c0_45 = arith.constant 0 : index
    %c0_46 = arith.constant 0 : index
    %150 = memref.load %arg3[%c0_45, %c0_46] : memref<4x4xf32, #tpu.memory_space<smem>>
    %151 = vector.extract_strided_slice %25 {offsets = [4, 0], sizes = [1, 256], strides = [1, 1]} : vector<8x256xf32> to vector<1x256xf32>
    %152 = vector.broadcast %150 : f32 to vector<1x256xf32>
    %153 = arith.mulf %152, %151 : vector<1x256xf32>
    %c0_47 = arith.constant 0 : index
    %c1_48 = arith.constant 1 : index
    %154 = memref.load %arg3[%c0_47, %c1_48] : memref<4x4xf32, #tpu.memory_space<smem>>
    %155 = vector.extract_strided_slice %25 {offsets = [5, 0], sizes = [1, 256], strides = [1, 1]} : vector<8x256xf32> to vector<1x256xf32>
    %156 = vector.broadcast %154 : f32 to vector<1x256xf32>
    %157 = arith.mulf %156, %155 : vector<1x256xf32>
    %158 = arith.addf %153, %157 : vector<1x256xf32>
    %c0_49 = arith.constant 0 : index
    %c2_50 = arith.constant 2 : index
    %159 = memref.load %arg3[%c0_49, %c2_50] : memref<4x4xf32, #tpu.memory_space<smem>>
    %160 = vector.extract_strided_slice %25 {offsets = [6, 0], sizes = [1, 256], strides = [1, 1]} : vector<8x256xf32> to vector<1x256xf32>
    %161 = vector.broadcast %159 : f32 to vector<1x256xf32>
    %162 = arith.mulf %161, %160 : vector<1x256xf32>
    %163 = arith.addf %158, %162 : vector<1x256xf32>
    %c0_51 = arith.constant 0 : index
    %c3_52 = arith.constant 3 : index
    %164 = memref.load %arg3[%c0_51, %c3_52] : memref<4x4xf32, #tpu.memory_space<smem>>
    %165 = vector.extract_strided_slice %25 {offsets = [7, 0], sizes = [1, 256], strides = [1, 1]} : vector<8x256xf32> to vector<1x256xf32>
    %166 = vector.broadcast %164 : f32 to vector<1x256xf32>
    %167 = arith.mulf %166, %165 : vector<1x256xf32>
    %168 = arith.addf %163, %167 : vector<1x256xf32>
    %c0_53 = arith.constant 0 : index
    %169 = memref.load %arg4[%c0_53] : memref<4xf32, #tpu.memory_space<smem>>
    %170 = vector.broadcast %169 : f32 to vector<1x256xf32>
    %171 = arith.addf %168, %170 : vector<1x256xf32>
    %172 = arith.negf %171 : vector<1x256xf32>
    %173 = math.exp %172 : vector<1x256xf32>
    %cst_54 = arith.constant 1.000000e+00 : f32
    %174 = vector.broadcast %cst_54 : f32 to vector<1x256xf32>
    %175 = arith.addf %174, %173 : vector<1x256xf32>
    %176 = arith.divf %174, %175 : vector<1x256xf32>
    %177 = vector.extract_strided_slice %1 {offsets = [4, 0], sizes = [1, 256], strides = [1, 1]} : vector<8x256xf32> to vector<1x256xf32>
    %cst_55 = arith.constant 1.000000e+00 : f32
    %178 = vector.broadcast %cst_55 : f32 to vector<1x256xf32>
    %179 = arith.addf %178, %176 : vector<1x256xf32>
    %180 = arith.mulf %177, %179 : vector<1x256xf32>
    %c1_56 = arith.constant 1 : index
    %c0_57 = arith.constant 0 : index
    %181 = memref.load %arg3[%c1_56, %c0_57] : memref<4x4xf32, #tpu.memory_space<smem>>
    %182 = vector.extract_strided_slice %25 {offsets = [4, 0], sizes = [1, 256], strides = [1, 1]} : vector<8x256xf32> to vector<1x256xf32>
    %183 = vector.broadcast %181 : f32 to vector<1x256xf32>
    %184 = arith.mulf %183, %182 : vector<1x256xf32>
    %c1_58 = arith.constant 1 : index
    %c1_59 = arith.constant 1 : index
    %185 = memref.load %arg3[%c1_58, %c1_59] : memref<4x4xf32, #tpu.memory_space<smem>>
    %186 = vector.extract_strided_slice %25 {offsets = [5, 0], sizes = [1, 256], strides = [1, 1]} : vector<8x256xf32> to vector<1x256xf32>
    %187 = vector.broadcast %185 : f32 to vector<1x256xf32>
    %188 = arith.mulf %187, %186 : vector<1x256xf32>
    %189 = arith.addf %184, %188 : vector<1x256xf32>
    %c1_60 = arith.constant 1 : index
    %c2_61 = arith.constant 2 : index
    %190 = memref.load %arg3[%c1_60, %c2_61] : memref<4x4xf32, #tpu.memory_space<smem>>
    %191 = vector.extract_strided_slice %25 {offsets = [6, 0], sizes = [1, 256], strides = [1, 1]} : vector<8x256xf32> to vector<1x256xf32>
    %192 = vector.broadcast %190 : f32 to vector<1x256xf32>
    %193 = arith.mulf %192, %191 : vector<1x256xf32>
    %194 = arith.addf %189, %193 : vector<1x256xf32>
    %c1_62 = arith.constant 1 : index
    %c3_63 = arith.constant 3 : index
    %195 = memref.load %arg3[%c1_62, %c3_63] : memref<4x4xf32, #tpu.memory_space<smem>>
    %196 = vector.extract_strided_slice %25 {offsets = [7, 0], sizes = [1, 256], strides = [1, 1]} : vector<8x256xf32> to vector<1x256xf32>
    %197 = vector.broadcast %195 : f32 to vector<1x256xf32>
    %198 = arith.mulf %197, %196 : vector<1x256xf32>
    %199 = arith.addf %194, %198 : vector<1x256xf32>
    %c1_64 = arith.constant 1 : index
    %200 = memref.load %arg4[%c1_64] : memref<4xf32, #tpu.memory_space<smem>>
    %201 = vector.broadcast %200 : f32 to vector<1x256xf32>
    %202 = arith.addf %199, %201 : vector<1x256xf32>
    %203 = arith.negf %202 : vector<1x256xf32>
    %204 = math.exp %203 : vector<1x256xf32>
    %cst_65 = arith.constant 1.000000e+00 : f32
    %205 = vector.broadcast %cst_65 : f32 to vector<1x256xf32>
    %206 = arith.addf %205, %204 : vector<1x256xf32>
    %207 = arith.divf %205, %206 : vector<1x256xf32>
    %208 = vector.extract_strided_slice %1 {offsets = [5, 0], sizes = [1, 256], strides = [1, 1]} : vector<8x256xf32> to vector<1x256xf32>
    %cst_66 = arith.constant 1.000000e+00 : f32
    %209 = vector.broadcast %cst_66 : f32 to vector<1x256xf32>
    %210 = arith.addf %209, %207 : vector<1x256xf32>
    %211 = arith.mulf %208, %210 : vector<1x256xf32>
    %c2_67 = arith.constant 2 : index
    %c0_68 = arith.constant 0 : index
    %212 = memref.load %arg3[%c2_67, %c0_68] : memref<4x4xf32, #tpu.memory_space<smem>>
    %213 = vector.extract_strided_slice %25 {offsets = [4, 0], sizes = [1, 256], strides = [1, 1]} : vector<8x256xf32> to vector<1x256xf32>
    %214 = vector.broadcast %212 : f32 to vector<1x256xf32>
    %215 = arith.mulf %214, %213 : vector<1x256xf32>
    %c2_69 = arith.constant 2 : index
    %c1_70 = arith.constant 1 : index
    %216 = memref.load %arg3[%c2_69, %c1_70] : memref<4x4xf32, #tpu.memory_space<smem>>
    %217 = vector.extract_strided_slice %25 {offsets = [5, 0], sizes = [1, 256], strides = [1, 1]} : vector<8x256xf32> to vector<1x256xf32>
    %218 = vector.broadcast %216 : f32 to vector<1x256xf32>
    %219 = arith.mulf %218, %217 : vector<1x256xf32>
    %220 = arith.addf %215, %219 : vector<1x256xf32>
    %c2_71 = arith.constant 2 : index
    %c2_72 = arith.constant 2 : index
    %221 = memref.load %arg3[%c2_71, %c2_72] : memref<4x4xf32, #tpu.memory_space<smem>>
    %222 = vector.extract_strided_slice %25 {offsets = [6, 0], sizes = [1, 256], strides = [1, 1]} : vector<8x256xf32> to vector<1x256xf32>
    %223 = vector.broadcast %221 : f32 to vector<1x256xf32>
    %224 = arith.mulf %223, %222 : vector<1x256xf32>
    %225 = arith.addf %220, %224 : vector<1x256xf32>
    %c2_73 = arith.constant 2 : index
    %c3_74 = arith.constant 3 : index
    %226 = memref.load %arg3[%c2_73, %c3_74] : memref<4x4xf32, #tpu.memory_space<smem>>
    %227 = vector.extract_strided_slice %25 {offsets = [7, 0], sizes = [1, 256], strides = [1, 1]} : vector<8x256xf32> to vector<1x256xf32>
    %228 = vector.broadcast %226 : f32 to vector<1x256xf32>
    %229 = arith.mulf %228, %227 : vector<1x256xf32>
    %230 = arith.addf %225, %229 : vector<1x256xf32>
    %c2_75 = arith.constant 2 : index
    %231 = memref.load %arg4[%c2_75] : memref<4xf32, #tpu.memory_space<smem>>
    %232 = vector.broadcast %231 : f32 to vector<1x256xf32>
    %233 = arith.addf %230, %232 : vector<1x256xf32>
    %234 = arith.negf %233 : vector<1x256xf32>
    %235 = math.exp %234 : vector<1x256xf32>
    %cst_76 = arith.constant 1.000000e+00 : f32
    %236 = vector.broadcast %cst_76 : f32 to vector<1x256xf32>
    %237 = arith.addf %236, %235 : vector<1x256xf32>
    %238 = arith.divf %236, %237 : vector<1x256xf32>
    %239 = vector.extract_strided_slice %1 {offsets = [6, 0], sizes = [1, 256], strides = [1, 1]} : vector<8x256xf32> to vector<1x256xf32>
    %cst_77 = arith.constant 1.000000e+00 : f32
    %240 = vector.broadcast %cst_77 : f32 to vector<1x256xf32>
    %241 = arith.addf %240, %238 : vector<1x256xf32>
    %242 = arith.mulf %239, %241 : vector<1x256xf32>
    %c3_78 = arith.constant 3 : index
    %c0_79 = arith.constant 0 : index
    %243 = memref.load %arg3[%c3_78, %c0_79] : memref<4x4xf32, #tpu.memory_space<smem>>
    %244 = vector.extract_strided_slice %25 {offsets = [4, 0], sizes = [1, 256], strides = [1, 1]} : vector<8x256xf32> to vector<1x256xf32>
    %245 = vector.broadcast %243 : f32 to vector<1x256xf32>
    %246 = arith.mulf %245, %244 : vector<1x256xf32>
    %c3_80 = arith.constant 3 : index
    %c1_81 = arith.constant 1 : index
    %247 = memref.load %arg3[%c3_80, %c1_81] : memref<4x4xf32, #tpu.memory_space<smem>>
    %248 = vector.extract_strided_slice %25 {offsets = [5, 0], sizes = [1, 256], strides = [1, 1]} : vector<8x256xf32> to vector<1x256xf32>
    %249 = vector.broadcast %247 : f32 to vector<1x256xf32>
    %250 = arith.mulf %249, %248 : vector<1x256xf32>
    %251 = arith.addf %246, %250 : vector<1x256xf32>
    %c3_82 = arith.constant 3 : index
    %c2_83 = arith.constant 2 : index
    %252 = memref.load %arg3[%c3_82, %c2_83] : memref<4x4xf32, #tpu.memory_space<smem>>
    %253 = vector.extract_strided_slice %25 {offsets = [6, 0], sizes = [1, 256], strides = [1, 1]} : vector<8x256xf32> to vector<1x256xf32>
    %254 = vector.broadcast %252 : f32 to vector<1x256xf32>
    %255 = arith.mulf %254, %253 : vector<1x256xf32>
    %256 = arith.addf %251, %255 : vector<1x256xf32>
    %c3_84 = arith.constant 3 : index
    %c3_85 = arith.constant 3 : index
    %257 = memref.load %arg3[%c3_84, %c3_85] : memref<4x4xf32, #tpu.memory_space<smem>>
    %258 = vector.extract_strided_slice %25 {offsets = [7, 0], sizes = [1, 256], strides = [1, 1]} : vector<8x256xf32> to vector<1x256xf32>
    %259 = vector.broadcast %257 : f32 to vector<1x256xf32>
    %260 = arith.mulf %259, %258 : vector<1x256xf32>
    %261 = arith.addf %256, %260 : vector<1x256xf32>
    %c3_86 = arith.constant 3 : index
    %262 = memref.load %arg4[%c3_86] : memref<4xf32, #tpu.memory_space<smem>>
    %263 = vector.broadcast %262 : f32 to vector<1x256xf32>
    %264 = arith.addf %261, %263 : vector<1x256xf32>
    %265 = arith.negf %264 : vector<1x256xf32>
    %266 = math.exp %265 : vector<1x256xf32>
    %cst_87 = arith.constant 1.000000e+00 : f32
    %267 = vector.broadcast %cst_87 : f32 to vector<1x256xf32>
    %268 = arith.addf %267, %266 : vector<1x256xf32>
    %269 = arith.divf %267, %268 : vector<1x256xf32>
    %270 = vector.extract_strided_slice %1 {offsets = [7, 0], sizes = [1, 256], strides = [1, 1]} : vector<8x256xf32> to vector<1x256xf32>
    %cst_88 = arith.constant 1.000000e+00 : f32
    %271 = vector.broadcast %cst_88 : f32 to vector<1x256xf32>
    %272 = arith.addf %271, %269 : vector<1x256xf32>
    %273 = arith.mulf %270, %272 : vector<1x256xf32>
    %274 = tpu.concatenate %56, %87, %118, %149, %180, %211, %242, %273 in 0 : vector<1x256xf32>, vector<1x256xf32>, vector<1x256xf32>, vector<1x256xf32>, vector<1x256xf32>, vector<1x256xf32>, vector<1x256xf32>, vector<1x256xf32> -> vector<8x256xf32>
    %c0_89 = arith.constant 0 : index
    %c0_90 = arith.constant 0 : index
    %c0_91 = arith.constant 0 : index
    %275 = vector.load %arg5[%c0_89, %c0_90, %c0_91] : memref<1x8x256xf32, #tpu.memory_space<vmem>>, vector<1x8x256xf32>
    %276 = vector.shape_cast %275 : vector<1x8x256xf32> to vector<8x256xf32>
    %277 = vector.shape_cast %274 : vector<8x256xf32> to vector<1x8x256xf32>
    tpu.vector_store %arg5[%c0_89, %c0_90, %c0_91], %277 {strides = array<i32>} : memref<1x8x256xf32, #tpu.memory_space<vmem>>, vector<1x8x256xf32>,
    return
  }
  func.func @transform_0(%arg0: i32) -> (i32, i32, i32) {
    %c0_i32 = arith.constant 0 : i32
    %c0_i32_0 = arith.constant 0 : i32
    %c0_i32_1 = arith.constant 0 : i32
    return %arg0, %c0_i32, %c0_i32_0 : i32, i32, i32
  }
  func.func @transform_1(%arg0: i32) -> (i32, i32) {
    %c0_i32 = arith.constant 0 : i32
    %c0_i32_0 = arith.constant 0 : i32
    %c0_i32_1 = arith.constant 0 : i32
    return %c0_i32, %c0_i32_0 : i32, i32
  }
  func.func @transform_2(%arg0: i32) -> (i32, i32) {
    %c0_i32 = arith.constant 0 : i32
    %c0_i32_0 = arith.constant 0 : i32
    %c0_i32_1 = arith.constant 0 : i32
    return %c0_i32, %c0_i32_0 : i32, i32
  }
  func.func @transform_3(%arg0: i32) -> i32 {
    %c0_i32 = arith.constant 0 : i32
    %c0_i32_0 = arith.constant 0 : i32
    return %c0_i32 : i32
  }
  func.func @transform_4(%arg0: i32) -> (i32, i32, i32) {
    %c0_i32 = arith.constant 0 : i32
    %c0_i32_0 = arith.constant 0 : i32
    %c0_i32_1 = arith.constant 0 : i32
    return %arg0, %c0_i32, %c0_i32_0 : i32, i32, i32
  }
}

</mosaic_0001>

<bundles_post_ra>
// kernel: dct_forward.1
= control target key start
LH: loop header
LB: loop body
LE: loop exit
PB: predicated region body
PF: predicated region fallthrough
CT: control target
= control target key end

     0   :  { %9 = vsyncpa [#allocation3], 0  ;;  %s773_s0 = inlined_call_operand.vmem [shape: f32[1,8,256], index: 0, kind: input, shape index: {}]   ;;  %s774_s1 = inlined_call_operand.vmem [shape: f32[4,256], index: 1, kind: input, shape index: {}]   ;;  %s775_s2 = inlined_call_operand.vmem [shape: f32[4,4], index: 2, kind: input, shape index: {}]   ;;  %s776_s3 = inlined_call_operand.vmem [shape: f32[4], index: 3, kind: input, shape index: {}]   ;;  %s777_s4 = inlined_call_operand.vmem [shape: f32[1,8,256], index: 4, kind: output, shape index: {}]  }
   0x1   :  { %s21_s17 = sshll.u32 %s775_s2, 4  ;;  %s22_s17 = int_to_ptr.vmem [resolvable:$true] %s21_s17 }
   0x2   :  { %10 = vsyncpa [#allocation5], 0  ;;  %s31_s20 = sshll.u32 %s776_s3, 4  ;;  %s519_s21 = scalar_lea.vmem %s22_s17, 64  ;;  %s32_s20 = int_to_ptr.vmem [resolvable:$true] %s31_s20 }
   0x3   :  { %p520_p0 = scmp.ne.s32.totalorder %s22_s17, %s519_s21  ;;  %p524_p1 = scmp.lt.s32.totalorder %s22_s17, %s22_s17 }
   0x4   :  { %p525_p2 = scmp.lt.s32.totalorder %s519_s21, %s519_s21 }
   0x6   :  { %p526_p3 = por %p525_p2, %p524_p1 }
   0x8   :  { %p527_p4 = pnand %p526_p3, %p520_p0 }
   0xa   :  { %530 = shalt.err (!%p527_p4)
}
   0xb   :  { %s547_s22 = smov [#allocation2]   ;;  %s531_s23 = scalar_lea.vmem %s32_s20, 16 }
   0xc   :  { %24 = dma.vmem_to_smem %s22_s17, 64, %s547_s22, [#allocation3]  }
   0xd   :  { %p532_p5 = scmp.ne.s32.totalorder %s32_s20, %s531_s23  ;;  %p536_p6 = scmp.lt.s32.totalorder %s32_s20, %s32_s20 }
   0xe   :  { %p537_p7 = scmp.lt.s32.totalorder %s531_s23, %s531_s23 }
  0x10   :  { %p538_p8 = por %p537_p7, %p536_p6 }
  0x12   :  { %p539_p9 = pnand %p538_p8, %p532_p5 }
  0x14   :  { %542 = shalt.err (!%p539_p9)
}
  0x15   :  { %s548_s2 = smov [#allocation4]  }
  0x16   :  { %34 = dma.vmem_to_smem %s32_s20, 16, %s548_s2, [#allocation5]  }
  0x17   :  { %543 = dma.done.wait [#allocation3], 64  }
  0x18   :  { %544 = vsyncadd [#allocation3], 4294967232 }
  0x19   :  { %545 = dma.done.wait [#allocation5], 16  }
  0x1a   :  { %546 = vsyncadd [#allocation5], 4294967280 }
  0x1b   :  { %41 = sfence }
  0x1c   :  { %v587_v0 = vld [vmem:[%s773_s0] sm:$0xff]  ;;  %s549_s25 = smov 127   ;;  %s550_s26 = smov 1   ;;  %v594_v1 = vld [vmem:[%s773_s0 + $0x8] sm:$0xff]  ;;  %v49_v2 = vlaneseq  ;;  %vm426_vm4 = vcmask 1040384   ;;  %vm429_vm5 = vcmask 1041408  }
  0x1d   :  { %75 = vrot.lane.b32.xlu1 %v587_v0, %s549_s25  ;;  %45 = vrot.lane.b32.xlu0 %v587_v0, %s550_s26  ;;  %v605_v6 = vld [vmem:[%s774_s1] sm:$0xff]  ;;  %s551_s0 = smov 16   ;;  %s552_s1 = smov 112   ;;  %v161_v53 = vmul.f32 9.0, %v594_v1  ;;  %v160_v56 = vmul.f32 9.0, %v587_v0  ;;  %vm432_vm6 = vcmask 1042432  }
  0x1e   :  { %v598_v3 = vshrl.u32 %v49_v2, 7  ;;  %v609_v9 = vand.u32 127, %v49_v2  ;;  %s619_s5 = sld [smem:[#allocation2]]  ;;  %vm435_vm7 = vcmask 1043456   ;;  %vm438_vm8 = vcmask 1044480  }
  0x1f   :  { %s621_s6 = sld [smem:[#allocation2 + $0x1]]  ;;  %vm441_vm9 = vcmask 1045504   ;;  %vm444_vm10 = vcmask 1046528  }
  0x20   :  { %v57_v4 = vsub.s32 0, %v598_v3  ;;  %v61_v5 = vsub.s32 4, %v598_v3  ;;  %v84_v7 = vsub.s32 1, %v598_v3  ;;  %v88_v8 = vsub.s32 5, %v598_v3  ;;  %s623_s7 = sld [smem:[#allocation2 + $0x2]] }
  0x21   :  { %77 = vrot.lane.b32.xlu1 %v594_v1, %s549_s25  ;;  %47 = vrot.lane.b32.xlu0 %v594_v1, %s550_s26  ;;  %vm79_vm0 = vcmp.lt.s32.totalorder %v609_v9, 127  ;;  %vm51_vm1 = vcmp.lt.s32.totalorder %v609_v9, 1  ;;  %s625_s8 = sld [smem:[#allocation2 + $0x3]]  ;;  %v115_v34 = vsub.s32 2, %v598_v3  ;;  %v119_v35 = vsub.s32 6, %v598_v3 }
  0x22   :  { %v58_v10 = vrot.slane %v605_v6, %v57_v4  ;;  %v62_v11 = vrot.slane %v605_v6, %v61_v5  ;;  %v85_v14 = vrot.slane %v605_v6, %v84_v7  ;;  %v89_v15 = vrot.slane %v605_v6, %v88_v8  ;;  %s627_s9 = sld [smem:[#allocation4]] }
  0x23   :  { %s631_s10 = sld [smem:[#allocation2 + $0x80]]  ;;  %v116_v36 = vrot.slane %v605_v6, %v115_v34  ;;  %v120_v37 = vrot.slane %v605_v6, %v119_v35  ;;  %v142_v38 = vsub.s32 3, %v598_v3  ;;  %v146_v39 = vsub.s32 7, %v598_v3 }
  0x24   :  { %v68_v16 = vrot.slane %v58_v10, %v57_v4  ;;  %v72_v17 = vrot.slane %v62_v11, %v57_v4  ;;  %v95_v18 = vrot.slane %v85_v14, %v84_v7  ;;  %v99_v19 = vrot.slane %v89_v15, %v84_v7  ;;  %s633_s11 = sld [smem:[#allocation2 + $0x81]] }
  0x25   :  { %s635_s12 = sld [smem:[#allocation2 + $0x82]]  ;;  %vm110_vm2 = vcmp.lt.s32.totalorder %v609_v9, 16  ;;  %v126_v40 = vrot.slane %v116_v36, %v115_v34  ;;  %v130_v41 = vrot.slane %v120_v37, %v115_v34  ;;  %v143_v42 = vrot.slane %v605_v6, %v142_v38 }
  0x26   :  { %s637_s13 = sld [smem:[#allocation2 + $0x83]]  ;;  %v147_v43 = vrot.slane %v605_v6, %v146_v39  ;;  %vm137_vm3 = vcmp.lt.s32.totalorder %v609_v9, 112  ;;  %v169_v54 = vstv %s619_s5  ;;  %v173_v57 = vstv %s621_s6 }
  0x27   :  { %s643_s14 = sld [smem:[#allocation4 + $0x1]]  ;;  %v153_v50 = vrot.slane %v143_v42, %v142_v38  ;;  %v185_v58 = vstv %s623_s7  ;;  %v197_v3 = vstv %s625_s8 }
  0x28   :  { %s645_s15 = sld [smem:[#allocation2 + $0x100]]  ;;  %v157_v51 = vrot.slane %v147_v43, %v142_v38  ;;  %v209_v4 = vstv %s627_s9 }
  0x29   :  { %s647_s16 = sld [smem:[#allocation2 + $0x101]]  ;;  %v229_v5 = vstv %s631_s10 }
  0x2a   :  { %s650_s17 = sld [smem:[#allocation2 + $0x102]]  ;;  %v233_v6 = vstv %s633_s11 }
  0x2b   :  { %s654_s18 = sld [smem:[#allocation2 + $0x103]]  ;;  %v245_v7 = vstv %s635_s12 }
  0x2c   :  { %s656_s19 = sld [smem:[#allocation4 + $0x2]]  ;;  %v257_v8 = vstv %s637_s13 }
  0x2d   :  { %s658_s20 = sld [smem:[#allocation2 + $0x180]]  ;;  %v269_v11 = vstv %s643_s14 }
  0x2e   :  { %s661_s21 = sld [smem:[#allocation2 + $0x181]] }
  0x2f   :  { %s663_s22 = sld [smem:[#allocation2 + $0x182]] }
  0x30   :  { %s665_s23 = sld [smem:[#allocation2 + $0x183]]  ;;  %v311_v14 = vstv %s650_s17 }
  0x31   :  { %v323_v15 = vstv %s654_s18  ;;  %s725_s2 = sld [smem:[#allocation4 + $0x3]] }
  0x8f   :  { %v76_v12 = vpop.permute.xlu1 %75  ;;  %v46_v13 = vpop.permute.xlu0 %45 }
  0x93   :  { %v78_v20 = vpop.permute.xlu1 %77  ;;  %v48_v21 = vpop.permute.xlu0 %47 }
  0x94   :  { %v80_v22 = vsel %vm79_vm0, %v76_v12, %v78_v20  ;;  %v81_v23 = vsel %vm79_vm0, %v78_v20, %v76_v12  ;;  %v52_v24 = vsel %vm51_vm1, %v46_v13, %v48_v21  ;;  %v53_v25 = vsel %vm51_vm1, %v48_v21, %v46_v13 }
  0x95   :  { %v73_v26 = vmul.f32 %v68_v16, %v53_v25  ;;  %v74_v27 = vmul.f32 %v72_v17, %v52_v24  ;;  %v100_v28 = vmul.f32 %v95_v18, %v80_v22  ;;  %v101_v29 = vmul.f32 %v99_v19, %v81_v23 }
  0x96   :  { %v295_v12 = vstv %s645_s15  ;;  %v299_v13 = vstv %s647_s16  ;;  %v335_v16 = vstv %s656_s19  ;;  %v361_v19 = vstv %s658_s20 }
  0x97   :  { %v102_v30 = vadd.f32 %v73_v26, %v587_v0  ;;  %v103_v31 = vadd.f32 %v74_v27, %v594_v1  ;;  %v365_v20 = vstv %s661_s21  ;;  %v377_v21 = vstv %s663_s22 }
  0x98   :  { %v389_v22 = vstv %s665_s23 }
  0x99   :  { %v104_v32 = vadd.f32 %v102_v30, %v100_v28  ;;  %v105_v33 = vadd.f32 %v103_v31, %v101_v29 }
  0x9b   :  { %106 = vrot.lane.b32.xlu0 %v104_v32, %s551_s0  ;;  %108 = vrot.lane.b32.xlu1 %v105_v33, %s551_s0 }
  0x9f   :  { %133 = vrot.lane.b32.xlu0 %v104_v32, %s552_s1  ;;  %135 = vrot.lane.b32.xlu1 %v105_v33, %s552_s1 }
 0x10d   :  { %v107_v44 = vpop.permute.xlu0 %106  ;;  %v109_v45 = vpop.permute.xlu1 %108 }
 0x10e   :  { %v111_v46 = vsel %vm110_vm2, %v107_v44, %v109_v45  ;;  %v112_v47 = vsel %vm110_vm2, %v109_v45, %v107_v44 }
 0x10f   :  { %v131_v48 = vmul.f32 %v126_v40, %v112_v47  ;;  %v132_v49 = vmul.f32 %v130_v41, %v111_v46 }
 0x111   :  { %v134_v52 = vpop.permute.xlu0 %133  ;;  %v136_v55 = vpop.permute.xlu1 %135  ;;  %v162_v61 = vadd.f32 %v131_v48, %v104_v32  ;;  %v163_v62 = vadd.f32 %v132_v49, %v105_v33 }
 0x112   :  { %v138_v59 = vsel %vm137_vm3, %v134_v52, %v136_v55  ;;  %v139_v60 = vsel %vm137_vm3, %v136_v55, %v134_v52 }
 0x113   :  { %v158_v63 = vmul.f32 %v153_v50, %v138_v59  ;;  %v159_v2 = vmul.f32 %v157_v51, %v139_v60 }
 0x115   :  { %v164_v9 = vadd.f32 %v162_v61, %v158_v63  ;;  %v165_v10 = vadd.f32 %v163_v62, %v159_v2 }
 0x117   :  { %v688_v17 = vsub.f32 %v160_v56, %v164_v9  ;;  %v690_v18 = vsub.f32 %v161_v53, %v165_v10 }
 0x119   :  { %v170_v23 = vmul.f32 %v169_v54, %v688_v17  ;;  %v171_v24 = vmul.f32 %v169_v54, %v690_v18  ;;  %v174_v25 = vmul.f32 %v173_v57, %v688_v17  ;;  %v175_v26 = vmul.f32 %v173_v57, %v690_v18 }
 0x11a   :  { %v186_v27 = vmul.f32 %v185_v58, %v688_v17  ;;  %v187_v28 = vmul.f32 %v185_v58, %v690_v18  ;;  %v198_v29 = vmul.f32 %v197_v3, %v688_v17  ;;  %v199_v30 = vmul.f32 %v197_v3, %v690_v18 }
 0x11b   :  { %v178_v31 = vrot.slane %v174_v25, 1  ;;  %v179_v32 = vrot.slane %v175_v26, 1  ;;  %v230_v33 = vmul.f32 %v229_v5, %v688_v17  ;;  %v231_v34 = vmul.f32 %v229_v5, %v690_v18 }
 0x11c   :  { %v190_v35 = vrot.slane %v186_v27, 2  ;;  %v191_v36 = vrot.slane %v187_v28, 2  ;;  %v202_v37 = vrot.slane %v198_v29, 3  ;;  %v203_v38 = vrot.slane %v199_v30, 3 }
 0x11d   :  { %v182_v39 = vadd.f32 %v178_v31, %v170_v23  ;;  %v183_v40 = vadd.f32 %v179_v32, %v171_v24  ;;  %v234_v41 = vmul.f32 %v233_v6, %v688_v17  ;;  %v235_v42 = vmul.f32 %v233_v6, %v690_v18 }
 0x11e   :  { %v246_v43 = vmul.f32 %v245_v7, %v688_v17  ;;  %v247_v44 = vmul.f32 %v245_v7, %v690_v18  ;;  %v258_v45 = vmul.f32 %v257_v8, %v688_v17  ;;  %v259_v46 = vmul.f32 %v257_v8, %v690_v18 }
 0x11f   :  { %v194_v47 = vadd.f32 %v190_v35, %v182_v39  ;;  %v195_v48 = vadd.f32 %v191_v36, %v183_v40  ;;  %v238_v49 = vrot.slane %v234_v41, 1  ;;  %v239_v50 = vrot.slane %v235_v42, 1 }
 0x120   :  { %v250_v51 = vrot.slane %v246_v43, 2  ;;  %v251_v52 = vrot.slane %v247_v44, 2  ;;  %v262_v53 = vrot.slane %v258_v45, 3  ;;  %v263_v54 = vrot.slane %v259_v46, 3 }
 0x121   :  { %v206_v55 = vadd.f32 %v202_v37, %v194_v47  ;;  %v207_v56 = vadd.f32 %v203_v38, %v195_v48  ;;  %v242_v57 = vadd.f32 %v238_v49, %v230_v33  ;;  %v243_v58 = vadd.f32 %v239_v50, %v231_v34 }
 0x122   :  { %v296_v59 = vmul.f32 %v295_v12, %v688_v17  ;;  %v297_v60 = vmul.f32 %v295_v12, %v690_v18  ;;  %v300_v61 = vmul.f32 %v299_v13, %v688_v17  ;;  %v301_v62 = vmul.f32 %v299_v13, %v690_v18 }
 0x123   :  { %v210_v63 = vadd.f32 %v209_v4, %v206_v55  ;;  %v211_v2 = vadd.f32 %v209_v4, %v207_v56  ;;  %v254_v3 = vadd.f32 %v250_v51, %v242_v57  ;;  %v255_v5 = vadd.f32 %v251_v52, %v243_v58 }
 0x124   :  { %v304_v6 = vrot.slane %v300_v61, 1  ;;  %v305_v7 = vrot.slane %v301_v62, 1  ;;  %v312_v8 = vmul.f32 %v311_v14, %v688_v17  ;;  %v313_v9 = vmul.f32 %v311_v14, %v690_v18 }
 0x125   :  { %v458_v10 = vmul.f32 -1.442695, %v210_v63  ;;  %v459_v12 = vmul.f32 -1.442695, %v211_v2  ;;  %v266_v23 = vadd.f32 %v262_v53, %v254_v3  ;;  %v267_v24 = vadd.f32 %v263_v54, %v255_v5 }
 0x126   :  { %v308_v25 = vadd.f32 %v304_v6, %v296_v59  ;;  %v309_v13 = vadd.f32 %v305_v7, %v297_v60  ;;  %v316_v4 = vrot.slane %v312_v8, 2  ;;  %v317_v26 = vrot.slane %v313_v9, 2 }
 0x127   :  { %487 = vpow2.f32 %v458_v10  ;;  %v270_v27 = vadd.f32 %v269_v11, %v266_v23  ;;  %v271_v28 = vadd.f32 %v269_v11, %v267_v24  ;;  %v324_v14 = vmul.f32 %v323_v15, %v688_v17 }
 0x128   :  { %489 = vpow2.f32 %v459_v12  ;;  %v320_v29 = vadd.f32 %v316_v4, %v308_v25  ;;  %v321_v30 = vadd.f32 %v317_v26, %v309_v13  ;;  %v325_v31 = vmul.f32 %v323_v15, %v690_v18 }
 0x129   :  { %v465_v32 = vmul.f32 -1.442695, %v270_v27  ;;  %v466_v33 = vmul.f32 -1.442695, %v271_v28  ;;  %v328_v34 = vrot.slane %v324_v14, 3  ;;  %v362_v11 = vmul.f32 %v361_v19, %v688_v17 }
 0x12a   :  { %v329_v35 = vrot.slane %v325_v31, 3  ;;  %v363_v36 = vmul.f32 %v361_v19, %v690_v18  ;;  %v366_v37 = vmul.f32 %v365_v20, %v688_v17  ;;  %v367_v38 = vmul.f32 %v365_v20, %v690_v18 }
 0x12b   :  { %491 = vpow2.f32 %v465_v32  ;;  %v332_v15 = vadd.f32 %v328_v34, %v320_v29  ;;  %v378_v39 = vmul.f32 %v377_v21, %v688_v17  ;;  %v379_v40 = vmul.f32 %v377_v21, %v690_v18 }
 0x12c   :  { %493 = vpow2.f32 %v466_v33  ;;  %v333_v41 = vadd.f32 %v329_v35, %v321_v30  ;;  %v370_v42 = vrot.slane %v366_v37, 1  ;;  %v371_v19 = vrot.slane %v367_v38, 1 }
 0x12d   :  { %v336_v43 = vadd.f32 %v335_v16, %v332_v15  ;;  %v382_v44 = vrot.slane %v378_v39, 2  ;;  %v383_v45 = vrot.slane %v379_v40, 2  ;;  %v390_v20 = vmul.f32 %v389_v22, %v688_v17 }
 0x12e   :  { %v337_v46 = vadd.f32 %v335_v16, %v333_v41  ;;  %v374_v47 = vadd.f32 %v370_v42, %v362_v11  ;;  %v375_v48 = vadd.f32 %v371_v19, %v363_v36  ;;  %v391_v49 = vmul.f32 %v389_v22, %v690_v18 }
 0x12f   :  { %v472_v21 = vmul.f32 -1.442695, %v336_v43  ;;  %v394_v50 = vrot.slane %v390_v20, 3  ;;  %v401_v55 = vstv %s725_s2 }
 0x130   :  { %v473_v51 = vmul.f32 -1.442695, %v337_v46  ;;  %v386_v52 = vadd.f32 %v382_v44, %v374_v47  ;;  %v387_v53 = vadd.f32 %v383_v45, %v375_v48  ;;  %v395_v54 = vrot.slane %v391_v49, 3 }
 0x131   :  { %495 = vpow2.f32 %v472_v21 }
 0x132   :  { %497 = vpow2.f32 %v473_v51  ;;  %v398_v56 = vadd.f32 %v394_v50, %v386_v52  ;;  %v399_v57 = vadd.f32 %v395_v54, %v387_v53 }
 0x134   :  { %v488_v58 = vpop.eup %487  ;;  %v402_v17 = vadd.f32 %v401_v55, %v398_v56  ;;  %v403_v59 = vadd.f32 %v401_v55, %v399_v57 }
 0x135   :  { %v490_v16 = vpop.eup %489  ;;  %v218_v2 = vadd.f32 1.0, %v488_v58 }
 0x136   :  { %v479_v60 = vmul.f32 -1.442695, %v402_v17  ;;  %v480_v61 = vmul.f32 -1.442695, %v403_v59  ;;  %v219_v3 = vadd.f32 1.0, %v490_v16 }
 0x138   :  { %v492_v62 = vpop.eup %491  ;;  %499 = vpow2.f32 %v479_v60 }
 0x139   :  { %v494_v63 = vpop.eup %493  ;;  %v278_v18 = vadd.f32 1.0, %v492_v62  ;;  %501 = vpow2.f32 %v480_v61 }
 0x13a   :  { %v279_v22 = vadd.f32 1.0, %v494_v63 }
 0x13b   :  { %503 = vrcp.f32 %v278_v18 }
 0x13c   :  { %505 = vrcp.f32 %v279_v22 }
 0x13d   :  { %507 = vrcp.f32 %v218_v2 }
 0x13e   :  { %v496_v5 = vpop.eup %495  ;;  %509 = vrcp.f32 %v219_v3 }
 0x13f   :  { %v498_v6 = vpop.eup %497  ;;  %v344_v7 = vadd.f32 1.0, %v496_v5 }
 0x140   :  { %v345_v8 = vadd.f32 1.0, %v498_v6 }
 0x141   :  { %511 = vrcp.f32 %v344_v7 }
 0x142   :  { %513 = vrcp.f32 %v345_v8 }
 0x145   :  { %v500_v9 = vpop.eup %499 }
 0x146   :  { %v502_v10 = vpop.eup %501  ;;  %v410_v12 = vadd.f32 1.0, %v500_v9 }
 0x147   :  { %v411_v24 = vadd.f32 1.0, %v502_v10 }
 0x148   :  { %v504_v23 = vpop.eup %503  ;;  %515 = vrcp.f32 %v410_v12 }
 0x149   :  { %v506_v25 = vpop.eup %505  ;;  %517 = vrcp.f32 %v411_v24  ;;  %v284_v13 = vadd.f32 1.0, %v504_v23 }
 0x14a   :  { %v508_v4 = vpop.eup %507  ;;  %v285_v26 = vadd.f32 1.0, %v506_v25 }
 0x14b   :  { %v510_v27 = vpop.eup %509  ;;  %v288_v29 = vrot.slane %v284_v13, 7  ;;  %v224_v33 = vadd.f32 1.0, %v508_v4 }
 0x14c   :  { %v289_v31 = vrot.slane %v285_v26, 7  ;;  %v225_v34 = vadd.f32 1.0, %v510_v27 }
 0x14d   :  { %v292_v35 = vmul.f32 %v288_v29, %v587_v0  ;;  %v226_v38 = vmul.f32 %v224_v33, %v587_v0 }
 0x14e   :  { %v512_v28 = vpop.eup %511  ;;  %v293_v37 = vmul.f32 %v289_v31, %v594_v1  ;;  %v227_v39 = vmul.f32 %v225_v34, %v594_v1 }
 0x14f   :  { %v514_v14 = vpop.eup %513  ;;  %v350_v30 = vadd.f32 1.0, %v512_v28  ;;  %v427_v43 = vsel %vm426_vm4, %v226_v38, %v292_v35 }
 0x150   :  { %v351_v32 = vadd.f32 1.0, %v514_v14  ;;  %v428_v45 = vsel %vm426_vm4, %v227_v39, %v293_v37 }
 0x151   :  { %v354_v11 = vrot.slane %v350_v30, 6 }
 0x152   :  { %v355_v36 = vrot.slane %v351_v32, 6 }
 0x153   :  { %v358_v40 = vmul.f32 %v354_v11, %v587_v0 }
 0x154   :  { %v359_v42 = vmul.f32 %v355_v36, %v594_v1 }
 0x155   :  { %v516_v15 = vpop.eup %515  ;;  %v430_v47 = vsel %vm429_vm5, %v427_v43, %v358_v40 }
 0x156   :  { %v518_v41 = vpop.eup %517  ;;  %v416_v19 = vadd.f32 1.0, %v516_v15  ;;  %v431_v49 = vsel %vm429_vm5, %v428_v45, %v359_v42 }
 0x157   :  { %v417_v44 = vadd.f32 1.0, %v518_v41 }
 0x158   :  { %v420_v20 = vrot.slane %v416_v19, 5 }
 0x159   :  { %v421_v46 = vrot.slane %v417_v44, 5 }
 0x15a   :  { %v424_v48 = vmul.f32 %v420_v20, %v587_v0 }
 0x15b   :  { %v425_v21 = vmul.f32 %v421_v46, %v594_v1 }
 0x15c   :  { %v433_v50 = vsel %vm432_vm6, %v430_v47, %v424_v48 }
 0x15d   :  { %v434_v51 = vsel %vm432_vm6, %v431_v49, %v425_v21  ;;  %v436_v52 = vsel %vm435_vm7, %v433_v50, %v226_v38 }
 0x15e   :  { %v437_v53 = vsel %vm435_vm7, %v434_v51, %v227_v39  ;;  %v439_v54 = vsel %vm438_vm8, %v436_v52, %v292_v35 }
 0x15f   :  { %v440_v55 = vsel %vm438_vm8, %v437_v53, %v293_v37  ;;  %v442_v56 = vsel %vm441_vm9, %v439_v54, %v358_v40 }
 0x160   :  { %v443_v57 = vsel %vm441_vm9, %v440_v55, %v359_v42  ;;  %v445_v58 = vsel %vm444_vm10, %v442_v56, %v424_v48 }
 0x161   :  { %v446_v17 = vsel %vm444_vm10, %v443_v57, %v425_v21  ;;  %447 = vst [vmem:[%s777_s4] sm:$0xff] %v445_v58 }
 0x162   :  { %448 = vst [vmem:[%s777_s4 + $0x8] sm:$0xff] %v446_v17 }
 0x163   :  { %453 = vsyncpa [#allocation3], 1 }
 0x164   :  { %454 = vsyncpa [#allocation5], 1 }

</bundles_post_ra>
